<compile_context>
chip_gen: v6e
topology: v6e:2x2x1
jax: 0.10.0
libtpu: 0.0.40
codegen_flags: <defaults>
</compile_context>

<pallas_src>
import functools

import jax
import jax.numpy as jnp
from jax.experimental import pallas as pl
from jax.experimental.pallas import tpu as pltpu

MARGIN = 2.0
EPS = 1e-6  # F.pairwise_distance default eps (added to the per-element diff, as in torch)


def _contrastive_loss_kernel(x1_ref, x2_ref, lbl_ref, out_ref, *, margin, batch, tile_b):
    # x1_ref, x2_ref: (tile_b, D) native dtype in VMEM
    # lbl_ref:        (tile_b, 1) f32 in VMEM
    # out_ref:        (1, 128)    f32 in VMEM -> per-tile partial sum (lane-dense)
    x1 = x1_ref[...].astype(jnp.float32)              # cast in-kernel (free vs. DMA)
    x2 = x2_ref[...].astype(jnp.float32)
    diff = x1 - x2 + EPS                               # matches torch pairwise_distance eps
    sq = jnp.sum(diff * diff, axis=-1, keepdims=True)  # (tile_b, 1), XLU lane reduce
    dist = jnp.sqrt(sq)                                # euclidean_distance

    lbl = lbl_ref[...]                                 # (tile_b, 1) f32 in {0, 1}
    hinge = jnp.maximum(margin - dist, 0.0)
    row_loss = (1.0 - lbl) * (dist * dist) + lbl * (hinge * hinge)   # (tile_b, 1)

    # Mask rows beyond the true batch (ragged last block; no host-side pad).
    row = pl.program_id(0) * tile_b + jax.lax.broadcasted_iota(
        jnp.int32, (tile_b, 1), 0
    )
    row_loss = jnp.where(row < batch, row_loss, 0.0)

    partial = jnp.sum(row_loss, axis=0, keepdims=True)               # (1, 1)
    out_ref[...] = jnp.broadcast_to(partial, out_ref.shape)          # lane-dense store


def _vmem_capacity_bytes():
    """Per-core VMEM capacity; conservative (v7x = 64 MiB) fallback."""
    try:
        return int(pltpu.get_tpu_info().vmem_capacity_bytes)
    except Exception:
        return 64 << 20


def _choose_tile_b(batch, feat, itemsize, vmem_cap):
    """Rows per tile so the pipelined working set stays under ~50% of VMEM."""
    budget = vmem_cap // 2
    # Per tile row: 2 inputs x 2 pipeline buffers (native dtype)
    #             + the lane-padded (row, 1) f32 label block x 2 buffers.
    per_row = 4 * feat * itemsize + 2 * 128 * 4
    rows = budget // per_row
    rows = max((int(rows) // 8) * 8, 8)    # sublane (8) alignment
    rows = min(rows, 8192)                 # big tiles amortize the ~0.35us/step cost
    b_pad8 = ((batch + 7) // 8) * 8
    return min(rows, b_pad8)


def contrastive_loss(output1, output2, label, *, margin=MARGIN, tile_b=None):
    B, D = output1.shape
    itemsize = jnp.dtype(output1.dtype).itemsize
    vmem_cap = _vmem_capacity_bytes()

    if tile_b is None:
        tile_b = _choose_tile_b(B, D, itemsize, vmem_cap)
    assert tile_b % 8 == 0 and tile_b > 0, "tile_b must be a positive multiple of 8"

    num_tiles = (B + tile_b - 1) // tile_b

    lbl = label.astype(jnp.float32).reshape(B, 1)

    # VMEM working set: 2 inputs x 2 buffers + lane-padded label + tiny out blocks.
    in_block = tile_b * D * itemsize
    lbl_block = tile_b * 128 * 4
    out_block = 128 * 4
    working = 4 * in_block + 2 * lbl_block + 2 * out_block
    vmem_limit = int(min(max(2 * working, 32 << 20), vmem_cap - (8 << 20)))

    partials = pl.pallas_call(
        functools.partial(
            _contrastive_loss_kernel,
            margin=float(margin),
            batch=B,
            tile_b=tile_b,
        ),
        out_shape=jax.ShapeDtypeStruct((num_tiles, 128), jnp.float32),
        grid=(num_tiles,),
        in_specs=[
            pl.BlockSpec((tile_b, D), lambda i: (i, 0)),
            pl.BlockSpec((tile_b, D), lambda i: (i, 0)),
            pl.BlockSpec((tile_b, 1), lambda i: (i, 0)),
        ],
        out_specs=pl.BlockSpec((1, 128), lambda i: (i, 0)),
        compiler_params=pltpu.CompilerParams(
            dimension_semantics=("parallel",),
            vmem_limit_bytes=vmem_limit,
        ),
        cost_estimate=pl.CostEstimate(
            flops=4 * B * D + 8 * B,
            transcendentals=B,                                   # one sqrt per row
            bytes_accessed=2 * B * D * itemsize + B * 4 + num_tiles * 128 * 4,
        ),
    )(output1, output2, lbl)

    # Tiny finalize outside the kernel: sum of per-tile partials, mean over B, /10.
    return jnp.sum(partials[:, 0]) / (B * 10.0)


def _reference(output1, output2, label, margin=MARGIN):
    # pure-JAX reference mirroring the PyTorch forward
    d = jnp.sqrt(jnp.sum((output1 - output2 + EPS) ** 2, axis=-1))
    lbl = label.astype(jnp.float32)
    loss = jnp.mean((1.0 - lbl) * d**2 + lbl * jnp.maximum(margin - d, 0.0) ** 2)
    return loss / 10.0


if __name__ == "__main__":
    key = jax.random.PRNGKey(0)
    k1, k2, k3 = jax.random.split(key, 3)

    # Small siamese embedding batch (matches the module's expected inputs).
    B, D = 8, 32
    output1 = jax.random.normal(k1, (B, D), dtype=jnp.float32)
    output2 = jax.random.normal(k2, (B, D), dtype=jnp.float32)
    label = jax.random.bernoulli(k3, 0.5, (B,)).astype(jnp.int32)

    loss = contrastive_loss(output1, output2, label)
    jax.block_until_ready(loss)
    ref = _reference(output1, output2, label)
    assert jnp.allclose(loss, ref, rtol=1e-5, atol=1e-6), (loss, ref)

    # Exercise the multi-tile grid, ragged (unpadded) last block masking,
    # and the native-bf16 DMA path.
    k4, k5, k6 = jax.random.split(jax.random.PRNGKey(1), 3)
    B2, D2 = 20, 128
    p1 = jax.random.normal(k4, (B2, D2), dtype=jnp.bfloat16)
    p2 = jax.random.normal(k5, (B2, D2), dtype=jnp.bfloat16)
    l2 = jax.random.bernoulli(k6, 0.5, (B2,)).astype(jnp.int32)
    loss2 = contrastive_loss(p1, p2, l2, tile_b=8)   # 3 tiles, last one ragged (4 rows)
    jax.block_until_ready(loss2)
    ref2 = _reference(p1.astype(jnp.float32), p2.astype(jnp.float32), l2)
    assert jnp.allclose(loss2, ref2, rtol=1e-4, atol=1e-5), (loss2, ref2)

    print("KERNEL_OK")
</pallas_src>

<mosaic_0001>
module attributes {stable_mosaic.version = 11 : i64} {
  func.func @_contrastive_loss_kernel(%arg0: i32, %arg1: memref<8x32xf32, #tpu.memory_space<vmem>>, %arg2: memref<8x32xf32, #tpu.memory_space<vmem>>, %arg3: memref<8x1xf32, #tpu.memory_space<vmem>>, %arg4: memref<1x128xf32, #tpu.memory_space<vmem>>) attributes {dimension_semantics = [#tpu.dimension_semantics<parallel>], iteration_bounds = array<i64: 1>, scalar_prefetch = 0 : i64, scratch_operands = 0 : i64, tpu.core_type = #tpu.core_type<tc>, window_params = [{transform_indices = @transform_0, window_bounds = array<i64: 8, 32>}, {transform_indices = @transform_1, window_bounds = array<i64: 8, 32>}, {transform_indices = @transform_2, window_bounds = array<i64: 8, 1>}, {transform_indices = @transform_3, window_bounds = array<i64: 1, 128>}]} {
    %c0 = arith.constant 0 : index
    %c0_0 = arith.constant 0 : index
    %0 = vector.load %arg1[%c0, %c0_0] : memref<8x32xf32, #tpu.memory_space<vmem>>, vector<8x32xf32>
    %c0_1 = arith.constant 0 : index
    %c0_2 = arith.constant 0 : index
    %1 = vector.load %arg2[%c0_1, %c0_2] : memref<8x32xf32, #tpu.memory_space<vmem>>, vector<8x32xf32>
    %2 = arith.subf %0, %1 : vector<8x32xf32>
    %cst = arith.constant 9.99999997E-7 : f32
    %3 = vector.broadcast %cst : f32 to vector<8x32xf32>
    %4 = arith.addf %2, %3 : vector<8x32xf32>
    %5 = arith.mulf %4, %4 : vector<8x32xf32>
    %cst_3 = arith.constant dense<0.000000e+00> : vector<8xf32>
    %6 = vector.multi_reduction <add>, %5, %cst_3 [1] : vector<8x32xf32> to vector<8xf32>
    %7 = vector.shape_cast %6 : vector<8xf32> to vector<8x1xf32>
    %8 = math.sqrt %7 : vector<8x1xf32>
    %c0_4 = arith.constant 0 : index
    %c0_5 = arith.constant 0 : index
    %9 = vector.load %arg3[%c0_4, %c0_5] : memref<8x1xf32, #tpu.memory_space<vmem>>, vector<8x1xf32>
    %cst_6 = arith.constant 2.000000e+00 : f32
    %10 = vector.broadcast %cst_6 : f32 to vector<8x1xf32>
    %11 = arith.subf %10, %8 : vector<8x1xf32>
    %cst_7 = arith.constant 0.000000e+00 : f32
    %12 = vector.broadcast %cst_7 : f32 to vector<8x1xf32>
    %13 = arith.maximumf %11, %12 : vector<8x1xf32>
    %cst_8 = arith.constant 1.000000e+00 : f32
    %14 = vector.broadcast %cst_8 : f32 to vector<8x1xf32>
    %15 = arith.subf %14, %9 : vector<8x1xf32>
    %16 = arith.mulf %8, %8 : vector<8x1xf32>
    %17 = arith.mulf %15, %16 : vector<8x1xf32>
    %18 = arith.mulf %13, %13 : vector<8x1xf32>
    %19 = arith.mulf %9, %18 : vector<8x1xf32>
    %20 = arith.addf %17, %19 : vector<8x1xf32>
    %c8_i32 = arith.constant 8 : i32
    %21 = arith.muli %arg0, %c8_i32 : i32
    %22 = tpu.iota {dimensions = array<i32: 0>} : vector<8x1xi32>
    %23 = vector.broadcast %21 : i32 to vector<8x1xi32>
    %24 = arith.addi %23, %22 : vector<8x1xi32>
    %c8_i32_9 = arith.constant 8 : i32
    %25 = vector.broadcast %c8_i32_9 : i32 to vector<8x1xi32>
    %26 = arith.cmpi slt, %24, %25 : vector<8x1xi32>
    %cst_10 = arith.constant 0.000000e+00 : f32
    %27 = vector.broadcast %cst_10 : f32 to vector<8x1xf32>
    %28 = arith.select %26, %20, %27 : vector<8x1xi1>, vector<8x1xf32>
    %cst_11 = arith.constant dense<0.000000e+00> : vector<1xf32>
    %29 = vector.multi_reduction <add>, %28, %cst_11 [0] : vector<8x1xf32> to vector<1xf32>
    %30 = vector.shape_cast %29 : vector<1xf32> to vector<1x1xf32>
    %31 = vector.shape_cast %30 : vector<1x1xf32> to vector<1x1xf32>
    %32 = vector.broadcast %31 : vector<1x1xf32> to vector<1x128xf32>
    %c0_12 = arith.constant 0 : index
    %c0_13 = arith.constant 0 : index
    %33 = vector.load %arg4[%c0_12, %c0_13] : memref<1x128xf32, #tpu.memory_space<vmem>>, vector<1x128xf32>
    tpu.vector_store %arg4[%c0_12, %c0_13], %32 {strides = array<i32>} : memref<1x128xf32, #tpu.memory_space<vmem>>, vector<1x128xf32>,
    return
  }
  func.func @transform_0(%arg0: i32) -> (i32, i32) {
    %c0_i32 = arith.constant 0 : i32
    %c0_i32_0 = arith.constant 0 : i32
    return %arg0, %c0_i32 : i32, i32
  }
  func.func @transform_1(%arg0: i32) -> (i32, i32) {
    %c0_i32 = arith.constant 0 : i32
    %c0_i32_0 = arith.constant 0 : i32
    return %arg0, %c0_i32 : i32, i32
  }
  func.func @transform_2(%arg0: i32) -> (i32, i32) {
    %c0_i32 = arith.constant 0 : i32
    %c0_i32_0 = arith.constant 0 : i32
    return %arg0, %c0_i32 : i32, i32
  }
  func.func @transform_3(%arg0: i32) -> (i32, i32) {
    %c0_i32 = arith.constant 0 : i32
    %c0_i32_0 = arith.constant 0 : i32
    return %arg0, %c0_i32 : i32, i32
  }
}

</mosaic_0001>

<bundles_post_ra>
// kernel: tpu_custom_call.1
= control target key start
LH: loop header
LB: loop body
LE: loop exit
PB: predicated region body
PF: predicated region fallthrough
CT: control target
= control target key end

     0   :  { %8 = vsyncpa [#allocation3], 0  ;;  %s173_s0 = inlined_call_operand.vmem [shape: f32[8,32], index: 0, kind: input, shape index: {}]   ;;  %s174_s1 = inlined_call_operand.hbm [shape: f32[8,32], index: 1, kind: input, shape index: {}]   ;;  %s175_s2 = inlined_call_operand.vmem [shape: f32[8,1], index: 2, kind: input, shape index: {}]   ;;  %s176_s3 = inlined_call_operand.hbm [shape: f32[1,128], index: 3, kind: output, shape index: {}]  }
   0x1   :  { %9 = vsyncpa [#allocation4], 0  ;;  %s138_s12 = smov [#allocation2]  }
   0x2   :  { %s18_s13 = sshll.u32 %s138_s12, 4  ;;  %s19_s13 = int_to_ptr.vmem [resolvable:$true] %s18_s13 }
   0x3   :  { %s102_s14 = scalar_lea.vmem %s19_s13, 128  ;;  %p107_p1 = scmp.lt.s32.totalorder %s19_s13, %s19_s13 }
   0x4   :  { %p103_p0 = scmp.ne.s32.totalorder %s19_s13, %s102_s14  ;;  %p108_p2 = scmp.lt.s32.totalorder %s102_s14, %s102_s14 }
   0x6   :  { %p109_p3 = por %p108_p2, %p107_p1 }
   0x8   :  { %p110_p4 = pnand %p109_p3, %p103_p0 }
   0xa   :  { %113 = shalt.err (!%p110_p4)
}
   0xb   :  { %21 = dma.hbm_to_vmem [thread:$0]  %s174_s1, 128, %s19_s13, [#allocation3]  }
   0xc   :  { %134 = dma.done.wait [#allocation3], 128  }
   0xd   :  { %135 = vsyncadd [#allocation3], 4294967168  ;;  %v27_v0 = vld [vmem:[%s173_s0] sm:$0xff]  ;;  %vm32_vm0 = vcmask 261120   ;;  %v139_v6 = vmov 0   ;;  %vm59_vm3 = vcmask 7168  }
   0xe   :  { %v28_v1 = vld [vmem:[#allocation2] sm:$0xff]  ;;  %91 = vset.pattern.permute.xlu0 %v139_v6  ;;  %s140_s19 = smov [#allocation5]  }
   0xf   :  { %v29_v2 = vsub.f32 %v27_v0, %v28_v1  ;;  %v43_v13 = vld [vmem:[%s175_s2] sm:$0xff]  ;;  %s79_s20 = sshll.u32 %s140_s19, 4  ;;  %s80_s20 = int_to_ptr.vmem [resolvable:$true] %s79_s20 }
  0x10   :  { %v46_v16 = vsub.f32 1.0, %v43_v13  ;;  %s114_s2 = scalar_lea.vmem %s80_s20, 16  ;;  %s118_s21 = scalar_lea.vmem %s80_s20, 32 }
  0x11   :  { %v30_v3 = vadd.f32 1e-06, %v29_v2  ;;  %p115_p5 = scmp.ne.s32.totalorder %s80_s20, %s114_s2  ;;  %p119_p6 = scmp.lt.s32.totalorder %s80_s20, %s80_s20 }
  0x12   :  { %p120_p7 = scmp.lt.s32.totalorder %s118_s21, %s114_s2 }
  0x13   :  { %v31_v4 = vmul.f32 %v30_v3, %v30_v3 }
  0x14   :  { %p121_p8 = por %p120_p7, %p119_p6 }
  0x15   :  { %v33_v5 = vsel %vm32_vm0, %v31_v4, 0.0 }
  0x16   :  { %34 = vadd.xlane.f32.xlu0 %v33_v5  ;;  %p122_p9 = pnand %p121_p8, %p115_p5 }
  0x9f   :  { %v35_v7 = vpop.xlane.xlu0 %34 }
  0xa0   :  { %92 = vrsqrt.f32 %v35_v7  ;;  %vm38_vm1 = vcmp.eq.f32.partialorder %v35_v7, inf  ;;  %v41_v10 = vand.u32 2147483648, %v35_v7  ;;  %vm40_vm2 = vcmp.eq.f32.partialorder %v35_v7, 0.0 }
  0xad   :  { %v93_v8 = vpop.eup %92 }
  0xae   :  { %v37_v9 = vmul.f32 %v93_v8, %v35_v7 }
  0xb0   :  { %v39_v11 = vsel %vm38_vm1, %v35_v7, %v37_v9 }
  0xb1   :  { %v42_v12 = vsel %vm40_vm2, %v41_v10, %v39_v11 }
  0xb2   :  { %v44_v14 = vsub.f32 2.0, %v42_v12  ;;  %v47_v17 = vmul.f32 %v42_v12, %v42_v12 }
  0xb4   :  { %v45_v15 = vmax.f32 %v44_v14, 0.0  ;;  %v48_v19 = vmul.f32 %v47_v17, %v46_v16 }
  0xb6   :  { %v49_v18 = vmul.f32 %v45_v15, %v45_v15 }
  0xb8   :  { %v50_v20 = vmul.f32 %v49_v18, %v43_v13 }
  0xba   :  { %v51_v21 = vadd.f32 %v50_v20, %v48_v19 }
  0xbc   :  { %v60_v22 = vsel %vm59_vm3, %v51_v21, 0.0 }
  0xbd   :  { %v61_v23 = vrot.slane %v60_v22, 4 }
  0xbf   :  { %v62_v24 = vadd.f32 %v61_v23, %v60_v22 }
  0xc1   :  { %v63_v25 = vrot.slane %v62_v24, 2 }
  0xc3   :  { %v64_v26 = vadd.f32 %v63_v25, %v62_v24 }
  0xc5   :  { %v65_v27 = vrot.slane %v64_v26, 1 }
  0xc7   :  { %v66_v28 = vadd.f32 %v65_v27, %v64_v26 }
  0xc9   :  { %69 = vperm.xlu0 %91, %v66_v28  }
 0x144   :  { %v70_v29 = vpop.permute.xlu0 %69 }
 0x145   :  { %72 = vst [vmem:[#allocation5] sm:$0x1] %v70_v29 }
 0x146   :  { %125 = shalt.err (!%p122_p9)
}
 0x147   :  { %82 = dma.vmem_to_hbm [thread:$0]  %s80_s20, 16, %s176_s3, [#allocation4]  }
 0x148   :  { %136 = dma.done.wait [#allocation4], 16  }
 0x149   :  { %137 = vsyncadd [#allocation4], 4294967280 }
 0x14a   :  { %86 = vsyncpa [#allocation3], 1 }
 0x14b   :  { %87 = vsyncpa [#allocation4], 1 }

</bundles_post_ra>
